<compile_context>
chip_gen: v7x
topology: tpu7x:2x2x1
jax: 0.10.0
libtpu: 0.0.40
codegen_flags: <defaults>
</compile_context>

<pallas_src>
import functools

import jax
import jax.numpy as jnp
from jax.experimental import pallas as pl
from jax.experimental.pallas import tpu as pltpu


def _ssa_body(v_ref, mask_ref, g_ref, waf_ref, baf_ref,
              wgo_ref, wgg_ref, bg_ref, o_ref):
    TB, N, Din = v_ref.shape
    H = waf_ref.shape[1] // 2

    # Flatten the batch tile so the projection is one big (TB*N, Din) @ (Din, 2H) matmul.
    v = v_ref[...].reshape(TB * N, Din)
    y = jnp.dot(v, waf_ref[...], preferred_element_type=jnp.float32) + baf_ref[...]
    logits = y[:, :H]                                   # attention branch
    feat = y[:, H:]                                     # feature branch

    # softmax over the hidden (last) axis — matches nn.Softmax(dim=-1) after the Linear
    m = jnp.max(logits, axis=-1, keepdims=True)
    e = jnp.exp(logits - m)
    inv = 1.0 / jnp.sum(e, axis=-1, keepdims=True)      # one divide per row
    att = e * inv

    if mask_ref is not None:
        att = att * mask_ref[...].reshape(TB * N, 1)    # (N,1)-style mask broadcast

    # weighted pooling over the token axis
    pooled = jnp.sum((att * feat).reshape(TB, N, H), axis=1)        # (TB, H)

    # global update: concat([pooled, g]) @ W_glb + b == pooled@Wg_out + g@Wg_g + b
    g = g_ref[...]                                                  # (TB, G)
    g_new = (jnp.dot(pooled, wgo_ref[...], preferred_element_type=jnp.float32)
             + jnp.dot(g, wgg_ref[...], preferred_element_type=jnp.float32)
             + bg_ref[...])

    o_ref[...] = (g + g_new).astype(o_ref.dtype)


def _kernel_with_mask(v_ref, mask_ref, g_ref, waf_ref, baf_ref,
                      wgo_ref, wgg_ref, bg_ref, o_ref):
    _ssa_body(v_ref, mask_ref, g_ref, waf_ref, baf_ref, wgo_ref, wgg_ref, bg_ref, o_ref)


def _kernel_no_mask(v_ref, g_ref, waf_ref, baf_ref,
                    wgo_ref, wgg_ref, bg_ref, o_ref):
    _ssa_body(v_ref, None, g_ref, waf_ref, baf_ref, wgo_ref, wgg_ref, bg_ref, o_ref)


def _pick_tb(B):
    """Batch tile: ~256 rows/step, multiple of 8 (sublane), >=2 grid steps when feasible."""
    half = (B + 1) // 2
    return int(min(256, max(8, -(-half // 8) * 8)))


@jax.jit
def simple_self_attention(v, g, params, mask=None):
    B, N, Din = v.shape
    H = params["w_att"].shape[1]
    G = params["w_glb_g"].shape[1]
    if g is None:
        g = jnp.zeros((B, G), v.dtype)

    # Fuse the two input projections into one (Din, 2H) matmul (halves MXU issues,
    # doubles lane occupancy of the projection output).
    w_af = jnp.concatenate([params["w_att"], params["w_feat"]], axis=1)   # (Din, 2H)
    b_af = jnp.concatenate([params["b_att"], params["b_feat"]], axis=1)   # (1, 2H)
    # TODO(synk): optionally cast w_af / v to bfloat16 on v6e/v7x (keep f32 accumulation);
    # kept f32 here so the 1e-5 check against the f32 reference holds.

    tb = _pick_tb(B)
    n_blk = pl.cdiv(B, tb)
    Bp = tb * n_blk
    if Bp != B:
        pad = Bp - B
        v = jnp.pad(v, ((0, pad), (0, 0), (0, 0)))
        g = jnp.pad(g, ((0, pad), (0, 0)))
        if mask is not None:
            mask = jnp.pad(mask, ((0, pad), (0, 0), (0, 0)))

    v_spec = pl.BlockSpec((tb, N, Din), lambda b: (b, 0, 0))
    mask_spec = pl.BlockSpec((tb, N, 1), lambda b: (b, 0, 0))
    g_spec = pl.BlockSpec((tb, G), lambda b: (b, 0))
    w_specs = [
        pl.BlockSpec((Din, 2 * H), lambda b: (0, 0)),   # fused W_att|W_feat
        pl.BlockSpec((1, 2 * H), lambda b: (0, 0)),     # fused biases
        pl.BlockSpec((H, G), lambda b: (0, 0)),         # W_glb (pooled part)
        pl.BlockSpec((G, G), lambda b: (0, 0)),         # W_glb (g part)
        pl.BlockSpec((1, G), lambda b: (0, 0)),         # b_glb
    ]
    compiler_params = pltpu.CompilerParams(
        dimension_semantics=("parallel",),
        vmem_limit_bytes=32 * 1024 * 1024,   # explicit, safe on v5e/v6e/v7x at these tiles
    )
    weights = (w_af, b_af, params["w_glb_out"], params["w_glb_g"], params["b_glb"])

    if mask is None:
        out = pl.pallas_call(
            _kernel_no_mask,
            out_shape=jax.ShapeDtypeStruct((Bp, G), jnp.float32),
            grid=(n_blk,),
            in_specs=[v_spec, g_spec] + w_specs,
            out_specs=g_spec,
            compiler_params=compiler_params,
        )(v, g, *weights)
    else:
        out = pl.pallas_call(
            _kernel_with_mask,
            out_shape=jax.ShapeDtypeStruct((Bp, G), jnp.float32),
            grid=(n_blk,),
            in_specs=[v_spec, mask_spec, g_spec] + w_specs,
            out_specs=g_spec,
            compiler_params=compiler_params,
        )(v, mask, g, *weights)

    return out[:B]


def init_params(key, in_dim, h_dim, g_dim):
    """Deterministic init mimicking nn.Linear default (uniform +-1/sqrt(fan_in))."""
    ks = jax.random.split(key, 6)
    s1 = 1.0 / jnp.sqrt(in_dim)
    s2 = 1.0 / jnp.sqrt(h_dim + g_dim)
    w_glb = jax.random.uniform(ks[4], (h_dim + g_dim, g_dim), jnp.float32, -s2, s2)
    return {
        # stored as (in, out) so the kernel does x @ W
        "w_att":  jax.random.uniform(ks[0], (in_dim, h_dim), jnp.float32, -s1, s1),
        "b_att":  jax.random.uniform(ks[1], (1, h_dim),      jnp.float32, -s1, s1),
        "w_feat": jax.random.uniform(ks[2], (in_dim, h_dim), jnp.float32, -s1, s1),
        "b_feat": jax.random.uniform(ks[3], (1, h_dim),      jnp.float32, -s1, s1),
        "w_glb_out": w_glb[:h_dim],     # (h_dim, g_dim)
        "w_glb_g":   w_glb[h_dim:],     # (g_dim, g_dim)
        "b_glb":  jax.random.uniform(ks[5], (1, g_dim), jnp.float32, -s2, s2),
    }


def reference(v, mask, g, params):
    """Pure-JAX reference matching the PyTorch forward."""
    att = jax.nn.softmax(v @ params["w_att"] + params["b_att"][0], axis=-1) * mask
    feat = v @ params["w_feat"] + params["b_feat"][0]
    pooled = jnp.sum(att * feat, axis=1)
    g_new = pooled @ params["w_glb_out"] + g @ params["w_glb_g"] + params["b_glb"][0]
    return g + g_new


if __name__ == "__main__":
    B, N, in_dim, h_dim, g_dim = 2, 8, 16, 32, 16

    key = jax.random.PRNGKey(0)
    k_v, k_g, k_m, k_p = jax.random.split(key, 4)
    v = jax.random.normal(k_v, (B, N, in_dim), jnp.float32)
    g = jax.random.normal(k_g, (B, g_dim), jnp.float32)
    mask = (jax.random.uniform(k_m, (B, N, 1)) > 0.3).astype(jnp.float32)
    params = init_params(k_p, in_dim, h_dim, g_dim)

    # masked path
    out = jax.block_until_ready(simple_self_attention(v, g, params, mask=mask))
    ref = reference(v, mask, g, params)
    assert out.shape == (B, g_dim)
    assert jnp.allclose(out, ref, atol=1e-5, rtol=1e-5), "mismatch vs reference (mask)"

    # default-mask path (mask=None) — specialized kernel with no mask load/multiply
    out2 = jax.block_until_ready(simple_self_attention(v, g, params, mask=None))
    ref2 = reference(v, jnp.ones((B, N, 1), jnp.float32), g, params)
    assert jnp.allclose(out2, ref2, atol=1e-5, rtol=1e-5), "mismatch vs reference (no mask)"

    print("KERNEL_OK")
</pallas_src>

<mosaic_0001>
module attributes {stable_mosaic.version = 11 : i64} {
  func.func @_kernel_with_mask(%arg0: i32, %arg1: memref<8x8x16xf32, #tpu.memory_space<vmem>>, %arg2: memref<8x8x1xf32, #tpu.memory_space<vmem>>, %arg3: memref<8x16xf32, #tpu.memory_space<vmem>>, %arg4: memref<16x64xf32, #tpu.memory_space<vmem>>, %arg5: memref<1x64xf32, #tpu.memory_space<vmem>>, %arg6: memref<32x16xf32, #tpu.memory_space<vmem>>, %arg7: memref<16x16xf32, #tpu.memory_space<vmem>>, %arg8: memref<1x16xf32, #tpu.memory_space<vmem>>, %arg9: memref<8x16xf32, #tpu.memory_space<vmem>>) attributes {dimension_semantics = [#tpu.dimension_semantics<parallel>], iteration_bounds = array<i64: 1>, scalar_prefetch = 0 : i64, scratch_operands = 0 : i64, tpu.core_type = #tpu.core_type<tc>, window_params = [{transform_indices = @transform_0, window_bounds = array<i64: 8, 8, 16>}, {transform_indices = @transform_1, window_bounds = array<i64: 8, 8, 1>}, {transform_indices = @transform_2, window_bounds = array<i64: 8, 16>}, {pipeline_mode = #tpu.pipeline_mode<synchronous>, transform_indices = @transform_3, window_bounds = array<i64: 16, 64>}, {pipeline_mode = #tpu.pipeline_mode<synchronous>, transform_indices = @transform_4, window_bounds = array<i64: 1, 64>}, {pipeline_mode = #tpu.pipeline_mode<synchronous>, transform_indices = @transform_5, window_bounds = array<i64: 32, 16>}, {pipeline_mode = #tpu.pipeline_mode<synchronous>, transform_indices = @transform_6, window_bounds = array<i64: 16, 16>}, {pipeline_mode = #tpu.pipeline_mode<synchronous>, transform_indices = @transform_7, window_bounds = array<i64: 1, 16>}, {transform_indices = @transform_8, window_bounds = array<i64: 8, 16>}]} {
    %c0 = arith.constant 0 : index
    %c0_0 = arith.constant 0 : index
    %c0_1 = arith.constant 0 : index
    %0 = vector.load %arg1[%c0, %c0_0, %c0_1] : memref<8x8x16xf32, #tpu.memory_space<vmem>>, vector<8x8x16xf32>
    %1 = vector.shape_cast %0 : vector<8x8x16xf32> to vector<64x16xf32>
    %c0_2 = arith.constant 0 : index
    %c0_3 = arith.constant 0 : index
    %2 = vector.load %arg4[%c0_2, %c0_3] : memref<16x64xf32, #tpu.memory_space<vmem>>, vector<16x64xf32>
    %cst = arith.constant dense<0.000000e+00> : vector<64x64xf32>
    %3 = tpu.matmul %1, %2, %cst {dimension_numbers = #tpu.dot_dimension_numbers<[1], [0], [0], [1], [0, 0, 1, 1], [], []>} : vector<64x16xf32>, vector<16x64xf32>, vector<64x64xf32> -> vector<64x64xf32>
    %c0_4 = arith.constant 0 : index
    %c0_5 = arith.constant 0 : index
    %4 = vector.load %arg5[%c0_4, %c0_5] : memref<1x64xf32, #tpu.memory_space<vmem>>, vector<1x64xf32>
    %5 = vector.broadcast %4 : vector<1x64xf32> to vector<64x64xf32>
    %6 = arith.addf %3, %5 : vector<64x64xf32>
    %7 = vector.extract_strided_slice %6 {offsets = [0, 0], sizes = [64, 32], strides = [1, 1]} : vector<64x64xf32> to vector<64x32xf32>
    %8 = vector.extract_strided_slice %6 {offsets = [0, 32], sizes = [64, 32], strides = [1, 1]} : vector<64x64xf32> to vector<64x32xf32>
    %cst_6 = arith.constant dense<0xFF800000> : vector<64xf32>
    %9 = vector.multi_reduction <maximumf>, %7, %cst_6 [1] : vector<64x32xf32> to vector<64xf32>
    %10 = vector.shape_cast %9 : vector<64xf32> to vector<64x1xf32>
    %11 = vector.broadcast %10 : vector<64x1xf32> to vector<64x32xf32>
    %12 = arith.subf %7, %11 : vector<64x32xf32>
    %13 = math.exp %12 : vector<64x32xf32>
    %cst_7 = arith.constant dense<0.000000e+00> : vector<64xf32>
    %14 = vector.multi_reduction <add>, %13, %cst_7 [1] : vector<64x32xf32> to vector<64xf32>
    %15 = vector.shape_cast %14 : vector<64xf32> to vector<64x1xf32>
    %cst_8 = arith.constant 1.000000e+00 : f32
    %16 = vector.broadcast %cst_8 : f32 to vector<64x1xf32>
    %17 = arith.divf %16, %15 : vector<64x1xf32>
    %18 = vector.broadcast %17 : vector<64x1xf32> to vector<64x32xf32>
    %19 = arith.mulf %13, %18 : vector<64x32xf32>
    %c0_9 = arith.constant 0 : index
    %c0_10 = arith.constant 0 : index
    %c0_11 = arith.constant 0 : index
    %20 = vector.load %arg2[%c0_9, %c0_10, %c0_11] : memref<8x8x1xf32, #tpu.memory_space<vmem>>, vector<8x8x1xf32>
    %21 = vector.shape_cast %20 : vector<8x8x1xf32> to vector<64x1xf32>
    %22 = vector.broadcast %21 : vector<64x1xf32> to vector<64x32xf32>
    %23 = arith.mulf %19, %22 : vector<64x32xf32>
    %24 = arith.mulf %23, %8 : vector<64x32xf32>
    %25 = vector.shape_cast %24 : vector<64x32xf32> to vector<8x8x32xf32>
    %cst_12 = arith.constant dense<0.000000e+00> : vector<8x32xf32>
    %26 = vector.multi_reduction <add>, %25, %cst_12 [1] : vector<8x8x32xf32> to vector<8x32xf32>
    %c0_13 = arith.constant 0 : index
    %c0_14 = arith.constant 0 : index
    %27 = vector.load %arg3[%c0_13, %c0_14] : memref<8x16xf32, #tpu.memory_space<vmem>>, vector<8x16xf32>
    %c0_15 = arith.constant 0 : index
    %c0_16 = arith.constant 0 : index
    %28 = vector.load %arg6[%c0_15, %c0_16] : memref<32x16xf32, #tpu.memory_space<vmem>>, vector<32x16xf32>
    %cst_17 = arith.constant dense<0.000000e+00> : vector<8x16xf32>
    %29 = tpu.matmul %26, %28, %cst_17 {dimension_numbers = #tpu.dot_dimension_numbers<[1], [0], [0], [1], [0, 0, 1, 1], [], []>} : vector<8x32xf32>, vector<32x16xf32>, vector<8x16xf32> -> vector<8x16xf32>
    %c0_18 = arith.constant 0 : index
    %c0_19 = arith.constant 0 : index
    %30 = vector.load %arg7[%c0_18, %c0_19] : memref<16x16xf32, #tpu.memory_space<vmem>>, vector<16x16xf32>
    %cst_20 = arith.constant dense<0.000000e+00> : vector<8x16xf32>
    %31 = tpu.matmul %27, %30, %cst_20 {dimension_numbers = #tpu.dot_dimension_numbers<[1], [0], [0], [1], [0, 0, 1, 1], [], []>} : vector<8x16xf32>, vector<16x16xf32>, vector<8x16xf32> -> vector<8x16xf32>
    %32 = arith.addf %29, %31 : vector<8x16xf32>
    %c0_21 = arith.constant 0 : index
    %c0_22 = arith.constant 0 : index
    %33 = vector.load %arg8[%c0_21, %c0_22] : memref<1x16xf32, #tpu.memory_space<vmem>>, vector<1x16xf32>
    %34 = vector.broadcast %33 : vector<1x16xf32> to vector<8x16xf32>
    %35 = arith.addf %32, %34 : vector<8x16xf32>
    %36 = arith.addf %27, %35 : vector<8x16xf32>
    %c0_23 = arith.constant 0 : index
    %c0_24 = arith.constant 0 : index
    %37 = vector.load %arg9[%c0_23, %c0_24] : memref<8x16xf32, #tpu.memory_space<vmem>>, vector<8x16xf32>
    tpu.vector_store %arg9[%c0_23, %c0_24], %36 {strides = array<i32>} : memref<8x16xf32, #tpu.memory_space<vmem>>, vector<8x16xf32>,
    return
  }
  func.func @transform_0(%arg0: i32) -> (i32, i32, i32) {
    %c0_i32 = arith.constant 0 : i32
    %c0_i32_0 = arith.constant 0 : i32
    %c0_i32_1 = arith.constant 0 : i32
    return %arg0, %c0_i32, %c0_i32_0 : i32, i32, i32
  }
  func.func @transform_1(%arg0: i32) -> (i32, i32, i32) {
    %c0_i32 = arith.constant 0 : i32
    %c0_i32_0 = arith.constant 0 : i32
    %c0_i32_1 = arith.constant 0 : i32
    return %arg0, %c0_i32, %c0_i32_0 : i32, i32, i32
  }
  func.func @transform_2(%arg0: i32) -> (i32, i32) {
    %c0_i32 = arith.constant 0 : i32
    %c0_i32_0 = arith.constant 0 : i32
    return %arg0, %c0_i32 : i32, i32
  }
  func.func @transform_3(%arg0: i32) -> (i32, i32) {
    %c0_i32 = arith.constant 0 : i32
    %c0_i32_0 = arith.constant 0 : i32
    %c0_i32_1 = arith.constant 0 : i32
    return %c0_i32, %c0_i32_0 : i32, i32
  }
  func.func @transform_4(%arg0: i32) -> (i32, i32) {
    %c0_i32 = arith.constant 0 : i32
    %c0_i32_0 = arith.constant 0 : i32
    %c0_i32_1 = arith.constant 0 : i32
    return %c0_i32, %c0_i32_0 : i32, i32
  }
  func.func @transform_5(%arg0: i32) -> (i32, i32) {
    %c0_i32 = arith.constant 0 : i32
    %c0_i32_0 = arith.constant 0 : i32
    %c0_i32_1 = arith.constant 0 : i32
    return %c0_i32, %c0_i32_0 : i32, i32
  }
  func.func @transform_6(%arg0: i32) -> (i32, i32) {
    %c0_i32 = arith.constant 0 : i32
    %c0_i32_0 = arith.constant 0 : i32
    %c0_i32_1 = arith.constant 0 : i32
    return %c0_i32, %c0_i32_0 : i32, i32
  }
  func.func @transform_7(%arg0: i32) -> (i32, i32) {
    %c0_i32 = arith.constant 0 : i32
    %c0_i32_0 = arith.constant 0 : i32
    %c0_i32_1 = arith.constant 0 : i32
    return %c0_i32, %c0_i32_0 : i32, i32
  }
  func.func @transform_8(%arg0: i32) -> (i32, i32) {
    %c0_i32 = arith.constant 0 : i32
    %c0_i32_0 = arith.constant 0 : i32
    return %arg0, %c0_i32 : i32, i32
  }
}

</mosaic_0001>

<bundles_post_ra>
// kernel: simple_self_attention.1
= control target key start
LH: loop header
LB: loop body
LE: loop exit
PB: predicated region body
PF: predicated region fallthrough
CT: control target
= control target key end

     0   :  { %vm46_vm0 = vcmask 130048   ;;  %v729_v11 = vmov 0   ;;  %vm176_vm1 = vcmask 261120   ;;  %s730_s10 = smov 96   ;;  %vm732_vm2 = vmmov 0   ;;  %s969_s3 = inlined_call_operand.vmem [shape: f32[16,64], index: 3, kind: input, shape index: {}]   ;;  %s970_s0 = inlined_call_operand.vmem [shape: f32[8,8,16], index: 0, kind: input, shape index: {}]   ;;  %s971_s4 = inlined_call_operand.vmem [shape: f32[1,64], index: 4, kind: input, shape index: {}]   ;;  %s972_s1 = inlined_call_operand.vmem [shape: f32[8,8,1], index: 1, kind: input, shape index: {}]   ;;  %s973_s6 = inlined_call_operand.vmem [shape: f32[16,16], index: 6, kind: input, shape index: {}]   ;;  %s974_s5 = inlined_call_operand.vmem [shape: f32[32,16], index: 5, kind: input, shape index: {}]   ;;  %s975_s2 = inlined_call_operand.vmem [shape: f32[8,16], index: 2, kind: input, shape index: {}]   ;;  %s976_s7 = inlined_call_operand.vmem [shape: f32[1,16], index: 7, kind: input, shape index: {}]   ;;  %s977_s8 = inlined_call_operand.vmem [shape: f32[8,16], index: 8, kind: output, shape index: {}]  }
   0x1   :  { %v37_v0 = vld [vmem:[%s969_s3] sm:$0xff]  ;;  %v38_v1 = vld [vmem:[%s969_s3 + $0x8] sm:$0xff]  ;;  %v31_v5 = vld [vmem:[%s970_s0 + $0x10] sm:$0xff]  ;;  %696 = vset.pattern.permute.xlu1 %v729_v11  ;;  %695 = vset.pattern.permute.xlu0 %v729_v11  ;;  %vm513_vm3 = vcmask 1041409   ;;  %vm515_vm4 = vcmask 1042434   ;;  %vm517_vm5 = vcmask 1043459  }
   0x2   :  { %v29_v2 = vld [vmem:[%s970_s0] sm:$0xff]  ;;  %v677_v3 = vpack.c.bf16 %v38_v1, %v37_v0  ;;  %v30_v4 = vld [vmem:[%s970_s0 + $0x8] sm:$0xff]  ;;  %v32_v6 = vld [vmem:[%s970_s0 + $0x18] sm:$0xff]  ;;  %vm519_vm6 = vcmask 1044484   ;;  %vm521_vm7 = vcmask 1045509   ;;  %vm523_vm8 = vcmask 1046534  }
   0x3   :  { %647 = vmatprep.mubr.msk.f32.mxu0 %vm46_vm0, %v29_v2  ;;  %v33_v7 = vld [vmem:[%s970_s0 + $0x20] sm:$0xff]  ;;  %v34_v8 = vld [vmem:[%s970_s0 + $0x28] sm:$0xff]  ;;  %v35_v9 = vld [vmem:[%s970_s0 + $0x30] sm:$0xff]  ;;  %vm525_vm9 = vcmask 1047559  }
   0x4   :  { %678 = vmatprep.subr.bf16.mxu0 %v677_v3  ;;  %v36_v10 = vld [vmem:[%s970_s0 + $0x38] sm:$0xff]  ;;  %v613_v12 = vld [vmem:[%s971_s4] ss:$0 sm:$0xff]  ;;  %v274_v37 = vld [vmem:[%s972_s1 + $0x8] sm:$0xff] }
   0x5   :  { %680 = vmatpush3.bf16.msra.mxu0 %v677_v3  ;;  %v273_v38 = vld [vmem:[%s972_s1] sm:$0xff]  ;;  %v275_v39 = vld [vmem:[%s972_s1 + $0x10] sm:$0xff]  ;;  %v276_v40 = vld [vmem:[%s972_s1 + $0x18] sm:$0xff] }
   0x6   :  { %v277_v41 = vld [vmem:[%s972_s1 + $0x20] sm:$0xff]  ;;  %v278_v42 = vld [vmem:[%s972_s1 + $0x28] sm:$0xff]  ;;  %v279_v43 = vld [vmem:[%s972_s1 + $0x30] sm:$0xff] }
   0x7   :  { %v280_v44 = vld [vmem:[%s972_s1 + $0x38] sm:$0xff] }
   0x8   :  { %648 = vmatmul.mubr.msk.f32.vlgmr.msra.gmra.mrb[0].mxu0 %vm46_vm0, %v30_v4 }
   0x9   :  { %650 = vmatprep.mubr.msk.f32.mxu0 %vm46_vm0, %v31_v5 }
   0xc   :  { %651 = vmatmul.mubr.msk.f32.gmra.mrb[2].mxu0 %vm46_vm0, %v32_v6 }
   0xd   :  { %653 = vmatprep.mubr.msk.f32.mxu0 %vm46_vm0, %v33_v7 }
  0x10   :  { %654 = vmatmul.mubr.msk.f32.gmra.mrb[4].mxu0 %vm46_vm0, %v34_v8 }
  0x11   :  { %656 = vmatprep.mubr.msk.f32.mxu0 %vm46_vm0, %v35_v9 }
  0x14   :  { %657 = vmatmul.mubr.msk.f32.gmra.mrb[6].mxu0 %vm46_vm0, %v36_v10 }
  0xdb   :  { %v649_v13 = vpop.f32.mrb[0].mxu0 }
  0xdc   :  { %v143_v14 = vadd.f32 %v649_v13, %v613_v12  ;;  %v137_v15 = vpop.f32.mrb[1].mxu0 }
  0xdd   :  { %v138_v16 = vadd.f32 %v613_v12, %v137_v15 }
  0xde   :  { %v180_v17 = vsel %vm176_vm1, %v143_v14, -inf }
  0xdf   :  { %181 = vmax.xlane.f32.xlu0 %v180_v17  ;;  %v652_v18 = vpop.f32.mrb[2].mxu0  ;;  %v177_v23 = vsel %vm176_vm1, %v138_v16, -inf }
  0xe0   :  { %v153_v19 = vadd.f32 %v652_v18, %v613_v12  ;;  %v147_v20 = vpop.f32.mrb[3].mxu0 }
  0xe1   :  { %v821_v21 = vadd.f32 %v613_v12, %v147_v20 }
  0xe2   :  { %v186_v22 = vsel %vm176_vm1, %v153_v19, -inf }
  0xe3   :  { %187 = vmax.xlane.f32.xlu1 %v186_v22  ;;  %v655_v24 = vpop.f32.mrb[4].mxu0  ;;  %178 = vmax.xlane.f32.xlu0 %v177_v23  ;;  %v183_v28 = vsel %vm176_vm1, %v821_v21, -inf  ;;  %v431_v22 = vld [vmem:[%s973_s6 + $0x8] sm:$0xff] }
  0xe4   :  { %v825_v25 = vadd.f32 %v655_v24, %v613_v12  ;;  %v157_v26 = vpop.f32.mrb[5].mxu0  ;;  %v731_v24 = vmov 0.0|0.0  }
  0xe5   :  { %v158_v27 = vadd.f32 %v613_v12, %v157_v26  ;;  %681 = vmatprep.subr.bf16.mxu1 %v731_v24  ;;  %v427_v26 = vld [vmem:[%s974_s5 + $0x8] sm:$0xff] }
  0xe6   :  { %v192_v33 = vsel %vm176_vm1, %v825_v25, -inf }
  0xe7   :  { %v658_v29 = vpop.f32.mrb[6].mxu0  ;;  %184 = vmax.xlane.f32.xlu1 %v183_v28  ;;  %v189_v30 = vsel %vm176_vm1, %v158_v27, -inf  ;;  %v927_v28 = vld [vmem:[%s975_s2] sm:$0xff] }
  0xe8   :  { %v830_v31 = vadd.f32 %v658_v29, %v613_v12  ;;  %v167_v32 = vpop.f32.mrb[7].mxu0  ;;  %190 = vmax.xlane.f32.xlu0 %v189_v30  ;;  %v428_v30 = vld [vmem:[%s974_s5 + $0x10] sm:$0xff] }
  0xe9   :  { %v834_v34 = vadd.f32 %v613_v12, %v167_v32 }
  0xea   :  { %v198_v36 = vsel %vm176_vm1, %v830_v31, -inf }
  0xeb   :  { %193 = vmax.xlane.f32.xlu1 %v192_v33  ;;  %v195_v35 = vsel %vm176_vm1, %v834_v34, -inf }
  0xec   :  { %196 = vmax.xlane.f32.xlu0 %v195_v35 }
  0xef   :  { %199 = vmax.xlane.f32.xlu1 %v198_v36 }
 0x100   :  { %288 = vperm.xlu1 %696, %v274_v37  }
 0x102   :  { %283 = vperm.xlu0 %695, %v273_v38  }
 0x104   :  { %293 = vperm.xlu1 %696, %v275_v39  }
 0x106   :  { %339 = vrot.lane.b32.xlu0 %v143_v14, %s730_s10 }
 0x108   :  { %298 = vperm.xlu1 %696, %v276_v40  }
 0x10a   :  { %343 = vrot.lane.b32.xlu0 %v153_v19, %s730_s10 }
 0x10c   :  { %303 = vperm.xlu1 %696, %v277_v41  }
 0x10e   :  { %347 = vrot.lane.b32.xlu0 %v825_v25, %s730_s10 }
 0x110   :  { %308 = vperm.xlu1 %696, %v278_v42  }
 0x114   :  { %313 = vperm.xlu1 %696, %v279_v43  }
 0x118   :  { %318 = vperm.xlu1 %696, %v280_v44  }
 0x11c   :  { %337 = vrot.lane.b32.xlu1 %v138_v16, %s730_s10 }
 0x120   :  { %341 = vrot.lane.b32.xlu1 %v821_v21, %s730_s10 }
 0x124   :  { %345 = vrot.lane.b32.xlu1 %v158_v27, %s730_s10 }
 0x16c   :  { %v182_v45 = vpop.xlane.xlu0 %181 }
 0x16d   :  { %v202_v46 = vsub.f32 %v143_v14, %v182_v45 }
 0x16f   :  { %v211_v47 = vmul.f32 1.442695, %v202_v46 }
 0x170   :  { %v188_v48 = vpop.xlane.xlu1 %187  ;;  %v179_v49 = vpop.xlane.xlu0 %178 }
 0x171   :  { %697 = vpow2.f32 %v211_v47  ;;  %v204_v50 = vsub.f32 %v153_v19, %v188_v48  ;;  %v201_v51 = vsub.f32 %v138_v16, %v179_v49 }
 0x173   :  { %v215_v52 = vmul.f32 1.442695, %v204_v50  ;;  %v209_v53 = vmul.f32 1.442695, %v201_v51 }
 0x174   :  { %v185_v54 = vpop.xlane.xlu1 %184 }
 0x175   :  { %699 = vpow2.f32 %v215_v52  ;;  %v203_v55 = vsub.f32 %v821_v21, %v185_v54  ;;  %v191_v56 = vpop.xlane.xlu0 %190  ;;  %v430_v21 = vld [vmem:[%s973_s6] sm:$0xff] }
 0x176   :  { %701 = vpow2.f32 %v209_v53  ;;  %v205_v57 = vsub.f32 %v158_v27, %v191_v56  ;;  %v682_v23 = vpack.c.bf16 %v431_v22, %v430_v21  ;;  %v733_v27 = vmov 0.0  }
 0x177   :  { %v213_v58 = vmul.f32 1.442695, %v203_v55  ;;  %663 = vmatprep.mubr.msk.f32.mxu1 %vm732_vm2, %v733_v27 }
 0x178   :  { %v217_v59 = vmul.f32 1.442695, %v205_v57  ;;  %v194_v60 = vpop.xlane.xlu1 %193  ;;  %683 = vmatpush3.bf16.msra.mxu1 %v682_v23 }
 0x179   :  { %703 = vpow2.f32 %v213_v58  ;;  %v206_v61 = vsub.f32 %v825_v25, %v194_v60  ;;  %v197_v62 = vpop.xlane.xlu0 %196  ;;  %684 = vmatprep.subr.bf16.mxu1 %v731_v24  ;;  %v426_v25 = vld [vmem:[%s974_s5] sm:$0xff] }
 0x17a   :  { %v207_v63 = vsub.f32 %v834_v34, %v197_v62  ;;  %705 = vpow2.f32 %v217_v59  ;;  %v685_v29 = vpack.c.bf16 %v427_v26, %v426_v25 }
 0x17b   :  { %v875_v0 = vpop.eup %697  ;;  %v219_v1 = vmul.f32 1.442695, %v206_v61  ;;  %664 = vmatmul.mubr.msk.f32.vlgmr.msra.gmra.mrb[0].mxu1 %vm46_vm0, %v927_v28 }
 0x17c   :  { %v221_v2 = vmul.f32 1.442695, %v207_v63  ;;  %v200_v3 = vpop.xlane.xlu1 %199  ;;  %v228_v4 = vsel %vm176_vm1, %v875_v0, 0.0  ;;  %686 = vmatpush3.bf16.msra.mxu1 %v685_v29  ;;  %674 = vmatprep.mubr.msk.f32.mxu1 %vm732_vm2, %v733_v27 }
 0x17d   :  { %707 = vpow2.f32 %v219_v1  ;;  %v208_v5 = vsub.f32 %v830_v31, %v200_v3  ;;  %229 = vadd.xlane.f32.xlu1 %v228_v4  ;;  %687 = vmatprep.subr.bf16.mxu1 %v731_v24 }
 0x17e   :  { %709 = vpow2.f32 %v221_v2 }
 0x17f   :  { %v880_v6 = vpop.eup %699  ;;  %v223_v7 = vmul.f32 1.442695, %v208_v5 }
 0x180   :  { %v882_v8 = vpop.eup %701  ;;  %v234_v9 = vsel %vm176_vm1, %v880_v6, 0.0  ;;  %v289_v33 = vpop.permute.xlu1 %288 }
 0x181   :  { %711 = vpow2.f32 %v223_v7  ;;  %235 = vadd.xlane.f32.xlu1 %v234_v9  ;;  %v225_v10 = vsel %vm176_vm1, %v882_v8, 0.0  ;;  %v284_v40 = vpop.permute.xlu0 %283 }
 0x182   :  { %226 = vadd.xlane.f32.xlu0 %v225_v10 }
 0x183   :  { %v888_v11 = vpop.eup %703 }
 0x184   :  { %v231_v12 = vsel %vm176_vm1, %v888_v11, 0.0  ;;  %v892_v13 = vpop.eup %705 }
 0x185   :  { %v237_v16 = vsel %vm176_vm1, %v892_v13, 0.0  ;;  %v340_v42 = vpop.permute.xlu0 %339 }
 0x186   :  { %232 = vadd.xlane.f32.xlu0 %v231_v12 }
 0x187   :  { %v894_v14 = vpop.eup %707 }
 0x188   :  { %v240_v15 = vsel %vm176_vm1, %v894_v14, 0.0  ;;  %v900_v17 = vpop.eup %709 }
 0x189   :  { %241 = vadd.xlane.f32.xlu1 %v240_v15  ;;  %v243_v20 = vsel %vm176_vm1, %v900_v17, 0.0  ;;  %v344_v44 = vpop.permute.xlu0 %343 }
 0x18a   :  { %238 = vadd.xlane.f32.xlu0 %v237_v16 }
 0x18b   :  { %v902_v18 = vpop.eup %711 }
 0x18c   :  { %v246_v19 = vsel %vm176_vm1, %v902_v18, 0.0 }
 0x18d   :  { %247 = vadd.xlane.f32.xlu1 %v246_v19  ;;  %v348_v47 = vpop.permute.xlu0 %347 }
 0x18e   :  { %244 = vadd.xlane.f32.xlu0 %v243_v20 }
 0x19e   :  { %349 = vrot.lane.b32.xlu1 %v834_v34, %s730_s10  ;;  %v294_v34 = vpop.permute.xlu1 %293 }
 0x1a2   :  { %v299_v35 = vpop.permute.xlu1 %298 }
 0x1a4   :  { %351 = vrot.lane.b32.xlu0 %v830_v31, %s730_s10  ;;  %v429_v31 = vld [vmem:[%s974_s5 + $0x18] sm:$0xff] }
 0x1a5   :  { %v688_v32 = vpack.c.bf16 %v429_v31, %v428_v30 }
 0x1a6   :  { %v304_v36 = vpop.permute.xlu1 %303 }
 0x1a7   :  { %689 = vmatpush3.bf16.msra.mxu1 %v688_v32 }
 0x1aa   :  { %v309_v37 = vpop.permute.xlu1 %308 }
 0x1ae   :  { %v937_v38 = vpop.permute.xlu1 %313 }
 0x1b2   :  { %v939_v39 = vpop.permute.xlu1 %318 }
 0x1b6   :  { %v338_v41 = vpop.permute.xlu1 %337 }
 0x1ba   :  { %v342_v43 = vpop.permute.xlu1 %341 }
 0x1be   :  { %v346_v45 = vpop.permute.xlu1 %345 }
 0x20a   :  { %v230_v46 = vpop.xlane.xlu1 %229 }
 0x20b   :  { %713 = vrcp.f32 %v230_v46 }
 0x20e   :  { %v236_v48 = vpop.xlane.xlu1 %235 }
 0x20f   :  { %715 = vrcp.f32 %v236_v48  ;;  %v227_v49 = vpop.xlane.xlu0 %226 }
 0x210   :  { %717 = vrcp.f32 %v227_v49 }
 0x213   :  { %v233_v50 = vpop.xlane.xlu0 %232 }
 0x214   :  { %719 = vrcp.f32 %v233_v50 }
 0x215   :  { %v714_v51 = vpop.eup %713 }
 0x216   :  { %v266_v52 = vmul.f32 %v714_v51, %v875_v0  ;;  %v242_v53 = vpop.xlane.xlu1 %241 }
 0x217   :  { %721 = vrcp.f32 %v242_v53  ;;  %v239_v54 = vpop.xlane.xlu0 %238 }
 0x218   :  { %v322_v55 = vmul.f32 %v289_v33, %v266_v52  ;;  %723 = vrcp.f32 %v239_v54 }
 0x219   :  { %v716_v56 = vpop.eup %715 }
 0x21a   :  { %v718_v57 = vpop.eup %717  ;;  %v362_v58 = vmul.f32 %v340_v42, %v322_v55  ;;  %v268_v59 = vmul.f32 %v716_v56, %v880_v6  ;;  %v248_v60 = vpop.xlane.xlu1 %247 }
 0x21b   :  { %v265_v61 = vmul.f32 %v718_v57, %v882_v8  ;;  %725 = vrcp.f32 %v248_v60  ;;  %v245_v62 = vpop.xlane.xlu0 %244 }
 0x21c   :  { %v376_v63 = vsel %vm176_vm1, %v362_v58, 0.0  ;;  %v324_v1 = vmul.f32 %v299_v35, %v268_v59  ;;  %727 = vrcp.f32 %v245_v62 }
 0x21d   :  { %v377_v0 = vrot.slane %v376_v63, 4  ;;  %v321_v2 = vmul.f32 %v284_v40, %v265_v61 }
 0x21e   :  { %v720_v3 = vpop.eup %719  ;;  %v364_v4 = vmul.f32 %v344_v44, %v324_v1  ;;  %v350_v50 = vpop.permute.xlu1 %349 }
 0x21f   :  { %v378_v5 = vadd.f32 %v377_v0, %v376_v63  ;;  %v361_v7 = vmul.f32 %v338_v41, %v321_v2  ;;  %v267_v9 = vmul.f32 %v720_v3, %v888_v11  ;;  %v352_v48 = vpop.permute.xlu0 %351 }
 0x220   :  { %v390_v10 = vsel %vm176_vm1, %v364_v4, 0.0 }
 0x221   :  { %v722_v6 = vpop.eup %721  ;;  %v391_v12 = vrot.slane %v390_v10, 4  ;;  %v369_v8 = vsel %vm176_vm1, %v361_v7, 0.0  ;;  %v323_v15 = vmul.f32 %v294_v34, %v267_v9  ;;  %v379_v21 = vrot.slane %v378_v5, 2 }
 0x222   :  { %v724_v16 = vpop.eup %723  ;;  %v370_v19 = vrot.slane %v369_v8, 4  ;;  %v270_v20 = vmul.f32 %v722_v6, %v894_v14 }
 0x223   :  { %v392_v22 = vadd.f32 %v391_v12, %v390_v10  ;;  %v363_v23 = vmul.f32 %v342_v43, %v323_v15  ;;  %v269_v24 = vmul.f32 %v724_v16, %v892_v13  ;;  %v380_v35 = vadd.f32 %v379_v21, %v378_v5 }
 0x224   :  { %v371_v25 = vadd.f32 %v370_v19, %v369_v8  ;;  %v326_v26 = vmul.f32 %v309_v37, %v270_v20 }
 0x225   :  { %v726_v27 = vpop.eup %725  ;;  %v383_v11 = vsel %vm176_vm1, %v363_v23, 0.0  ;;  %v325_v29 = vmul.f32 %v304_v36, %v269_v24  ;;  %v393_v40 = vrot.slane %v392_v22, 2 }
 0x226   :  { %v728_v30 = vpop.eup %727  ;;  %v372_v31 = vrot.slane %v371_v25, 2  ;;  %v384_v32 = vrot.slane %v383_v11, 4  ;;  %v366_v33 = vmul.f32 %v348_v47, %v326_v26  ;;  %v272_v34 = vmul.f32 %v726_v27, %v902_v18 }
 0x227   :  { %v365_v14 = vmul.f32 %v346_v45, %v325_v29  ;;  %v271_v41 = vmul.f32 %v728_v30, %v900_v17  ;;  %v381_v45 = vrot.slane %v380_v35, 1  ;;  %v394_v52 = vadd.f32 %v393_v40, %v392_v22 }
 0x228   :  { %v373_v42 = vadd.f32 %v372_v31, %v371_v25  ;;  %v385_v43 = vadd.f32 %v384_v32, %v383_v11  ;;  %v404_v13 = vsel %vm176_vm1, %v366_v33, 0.0  ;;  %v328_v37 = vmul.f32 %v939_v39, %v272_v34  ;;  %v624_v33 = vld [vmem:[%s976_s7] ss:$0 sm:$0xff] }
 0x229   :  { %v405_v44 = vrot.slane %v404_v13, 4  ;;  %v397_v36 = vsel %vm176_vm1, %v365_v14, 0.0  ;;  %v327_v46 = vmul.f32 %v937_v38, %v271_v41  ;;  %v382_v62 = vadd.f32 %v381_v45, %v380_v35 }
 0x22a   :  { %v374_v47 = vrot.slane %v373_v42, 1  ;;  %v386_v49 = vrot.slane %v385_v43, 2  ;;  %v398_v18 = vrot.slane %v397_v36, 4  ;;  %v368_v51 = vmul.f32 %v352_v48, %v328_v37 }
 0x22b   :  { %v406_v17 = vadd.f32 %v405_v44, %v404_v13  ;;  %v367_v53 = vmul.f32 %v350_v50, %v327_v46  ;;  %v395_v1 = vrot.slane %v394_v52, 1 }
 0x22c   :  { %v387_v54 = vadd.f32 %v386_v49, %v385_v43  ;;  %v399_v55 = vadd.f32 %v398_v18, %v397_v36  ;;  %v418_v56 = vsel %vm176_vm1, %v368_v51, 0.0  ;;  %v375_v39 = vadd.f32 %v374_v47, %v373_v42 }
 0x22d   :  { %v411_v57 = vsel %vm176_vm1, %v367_v53, 0.0  ;;  %v419_v58 = vrot.slane %v418_v56, 4  ;;  %v407_v38 = vrot.slane %v406_v17, 2  ;;  %v396_v15 = vadd.f32 %v395_v1, %v394_v52 }
 0x22e   :  { %v388_v59 = vrot.slane %v387_v54, 1  ;;  %v400_v60 = vrot.slane %v399_v55, 2  ;;  %v412_v61 = vrot.slane %v411_v57, 4  ;;  %v514_v9 = vsel %vm513_vm3, %v382_v62, %v375_v39 }
 0x22f   :  { %v420_v63 = vadd.f32 %v419_v58, %v418_v56  ;;  %v408_v0 = vadd.f32 %v407_v38, %v406_v17 }
 0x230   :  { %v413_v2 = vadd.f32 %v412_v61, %v411_v57  ;;  %v389_v3 = vadd.f32 %v388_v59, %v387_v54  ;;  %v401_v4 = vadd.f32 %v400_v60, %v399_v55 }
 0x231   :  { %v421_v5 = vrot.slane %v420_v63, 2  ;;  %v409_v7 = vrot.slane %v408_v0, 1 }
 0x232   :  { %v414_v10 = vrot.slane %v413_v2, 2  ;;  %v402_v6 = vrot.slane %v401_v4, 1  ;;  %v516_v12 = vsel %vm515_vm4, %v389_v3, %v514_v9 }
 0x233   :  { %v422_v8 = vadd.f32 %v421_v5, %v420_v63  ;;  %v410_v21 = vadd.f32 %v409_v7, %v408_v0  ;;  %v518_v22 = vsel %vm517_vm5, %v396_v15, %v516_v12 }
 0x234   :  { %v415_v16 = vadd.f32 %v414_v10, %v413_v2  ;;  %v403_v19 = vadd.f32 %v402_v6, %v401_v4 }
 0x235   :  { %v423_v20 = vrot.slane %v422_v8, 1 }
 0x236   :  { %v416_v23 = vrot.slane %v415_v16, 1  ;;  %v520_v24 = vsel %vm519_vm6, %v403_v19, %v518_v22 }
 0x237   :  { %v424_v25 = vadd.f32 %v423_v20, %v422_v8  ;;  %v522_v27 = vsel %vm521_vm7, %v410_v21, %v520_v24 }
 0x238   :  { %v417_v26 = vadd.f32 %v416_v23, %v415_v16 }
 0x23a   :  { %v524_v11 = vsel %vm523_vm8, %v417_v26, %v522_v27 }
 0x23b   :  { %v526_v29 = vsel %vm525_vm9, %v424_v25, %v524_v11 }
 0x23c   :  { %675 = vmatmul.mubr.msk.f32.vlgmr.msra.gmra.mrb[2].mxu1 %vm176_vm1, %v526_v29 }
 0x24e   :  { %v501_v30 = vpop.f32.mrb[0].mxu1 }
 0x24f   :  { %v665_v31 = vpop.f32.mrb[1].mxu1 }
 0x30f   :  { %v595_v32 = vpop.f32.mrb[2].mxu1 }
 0x310   :  { %v596_v34 = vadd.f32 %v595_v32, %v501_v30  ;;  %v676_v35 = vpop.f32.mrb[3].mxu1 }
 0x312   :  { %v606_v40 = vadd.f32 %v624_v33, %v596_v34 }
 0x314   :  { %v607_v14 = vadd.f32 %v606_v40, %v927_v28 }
 0x316   :  { %608 = vst.msk [vmem:[%s977_s8] sm:$0xff] %vm46_vm0, %v607_v14 }

</bundles_post_ra>
